<compile_context>
chip_gen: v6e
topology: v6e:2x2x1
jax: 0.10.0
libtpu: 0.0.40
codegen_flags: <defaults>
</compile_context>

<pallas_src>
import jax
import jax.numpy as jnp
from jax.experimental import pallas as pl
from jax.experimental.pallas import tpu as pltpu

LANE = 128


def _round_up(n, m):
    return ((n + m - 1) // m) * m


def _mlp_kernel(x_ref, w0_ref, wr_ref, b_ref, o_ref):
    # x_ref: (tm, input_s) f32 -> bf16 cast is cheap VPU work hidden under DMA.
    h = x_ref[...].astype(jnp.bfloat16)

    # Layer 0: contract over the unpadded input width (MXU handles K=36).
    acc = jnp.dot(h, w0_ref[...], preferred_element_type=jnp.float32)
    acc = jnp.maximum(acc + b_ref[0], 0.0)          # f32 bias add + ReLU

    # Remaining layers: (P x P) lane-dense weights, unrolled at trace time.
    num_rest = wr_ref.shape[0]
    for li in range(num_rest):
        h = acc.astype(jnp.bfloat16)
        acc = jnp.dot(h, wr_ref[li], preferred_element_type=jnp.float32)
        acc = jnp.maximum(acc + b_ref[li + 1], 0.0)

    o_ref[...] = acc.astype(o_ref.dtype)            # bf16 lane-dense store


def prepare_params(params):
    """Stack + zero-pad weights/biases once (not per forward call).

    params: list of (W_t=[fan_in, fan_out] f32, b=[fan_out] f32), layer 0 first.
    """
    num_layers = len(params)
    assert num_layers >= 2
    input_s = params[0][0].shape[0]
    output_s = params[-1][0].shape[1]
    # Pad every layer-output (and hence hidden fan-in) width to 128 lanes.
    P = max(_round_up(w.shape[1], LANE) for (w, _) in params)

    w0_t, b0 = params[0]
    w0 = jnp.zeros((input_s, P), jnp.bfloat16)
    w0 = w0.at[:, : w0_t.shape[1]].set(w0_t.astype(jnp.bfloat16))

    w_rest = jnp.zeros((num_layers - 1, P, P), jnp.bfloat16)
    b_stack = jnp.zeros((num_layers, 1, P), jnp.float32)
    b_stack = b_stack.at[0, 0, : b0.shape[0]].set(b0.reshape(-1).astype(jnp.float32))
    for li in range(1, num_layers):
        w_t, b = params[li]
        fi, fo = w_t.shape
        w_rest = w_rest.at[li - 1, :fi, :fo].set(w_t.astype(jnp.bfloat16))
        b_stack = b_stack.at[li, 0, :fo].set(b.reshape(-1).astype(jnp.float32))

    return {"w0": w0, "w_rest": w_rest, "b": b_stack,
            "input_s": input_s, "output_s": output_s, "P": P,
            "num_layers": num_layers}


def warp_embedding_mlp(x, prepared, *, tm=2048):
    """x: [N, input_s] f32.  prepared: output of prepare_params()."""
    N, input_s = x.shape
    assert input_s == prepared["input_s"]
    P = prepared["P"]
    output_s = prepared["output_s"]
    num_layers = prepared["num_layers"]
    w0, w_rest, b_stack = prepared["w0"], prepared["w_rest"], prepared["b"]

    # Row tile: large for MXU occupancy / per-step-overhead amortization, but
    # capped so the grid has >= 2 steps (keeps both v7x TensorCores busy via
    # the "parallel" axis); multiple of 16 keeps bf16 output blocks tile-aligned.
    tm_eff = max(16, min(tm, _round_up(-(-N // 2), 16)))
    n_pad = _round_up(N, tm_eff)
    grid = n_pad // tm_eff

    # Only row padding (to a tile multiple) happens in the wrapper; skipped
    # entirely when N already lines up.
    if n_pad != N:
        x = jnp.pad(x, ((0, n_pad - N), (0, 0)))

    # VMEM/step @ tm=2048: ~0.3 MiB x (2 buf) + 0.5 MiB out x (2 buf) +
    # ~0.2 MiB resident weights -> well under every generation's scoped limit,
    # so no vmem_limit_bytes override is needed.
    out_p = pl.pallas_call(
        _mlp_kernel,
        out_shape=jax.ShapeDtypeStruct((n_pad, P), jnp.bfloat16),
        grid_spec=pltpu.PrefetchScalarGridSpec(
            num_scalar_prefetch=0,
            grid=(grid,),
            in_specs=[
                pl.BlockSpec((tm_eff, input_s), lambda i: (i, 0)),
                # Weights/biases: constant index_map -> resident across steps.
                pl.BlockSpec((input_s, P), lambda i: (0, 0)),
                pl.BlockSpec((num_layers - 1, P, P), lambda i: (0, 0, 0)),
                pl.BlockSpec((num_layers, 1, P), lambda i: (0, 0, 0)),
            ],
            out_specs=pl.BlockSpec((tm_eff, P), lambda i: (i, 0)),
        ),
        compiler_params=pltpu.CompilerParams(
            dimension_semantics=("parallel",)),
    )(x, w0, w_rest, b_stack)

    # NOTE: this slice is a second HBM pass over the padded bf16 output; callers
    # that can consume the padded (n_pad, P) block directly should fuse it away.
    return out_p[:N, :output_s]


def init_params(key, num_layers=4, hidden_size=64, input_s=36, output_s=36):
    """Mimics torch.nn.Linear default init: U[-1/sqrt(fan_in), 1/sqrt(fan_in)]."""
    dims = [input_s] + [hidden_size] * (num_layers - 1) + [output_s]
    params = []
    for li in range(num_layers):
        fan_in, fan_out = dims[li], dims[li + 1]
        key, kw, kb = jax.random.split(key, 3)
        bound = 1.0 / jnp.sqrt(jnp.float32(fan_in))
        # Stored already transposed: [fan_in, fan_out] (PyTorch stores [out, in]).
        w_t = jax.random.uniform(kw, (fan_in, fan_out), jnp.float32, -bound, bound)
        b = jax.random.uniform(kb, (fan_out,), jnp.float32, -bound, bound)
        params.append((w_t, b))
    return params


def reference_mlp(x, params):
    h = x
    for (w_t, b) in params:
        h = jnp.maximum(h @ w_t + b, 0.0)
    return h


if __name__ == "__main__":
    key = jax.random.PRNGKey(0)
    key, kx = jax.random.split(key)

    # Non-multiple-of-8 batch exercises the row-padding path; tm cap gives grid=2.
    N, input_s = 19, 36
    x = jax.random.normal(kx, (N, input_s), jnp.float32)

    params = init_params(key, num_layers=4, hidden_size=64,
                         input_s=input_s, output_s=36)
    prepared = prepare_params(params)          # built once, reused every call

    fwd = jax.jit(lambda xx: warp_embedding_mlp(xx, prepared))
    out = jax.block_until_ready(fwd(x))
    ref = reference_mlp(x, params)

    assert out.shape == (N, 36)
    # bf16 MXU operands + bf16 output store -> relaxed tolerance vs f32 reference.
    assert jnp.allclose(out.astype(jnp.float32), ref, atol=5e-2, rtol=5e-2), \
        "mismatch vs reference"

    print("KERNEL_OK")
</pallas_src>

<mosaic_0001>
module attributes {stable_mosaic.version = 11 : i64} {
  func.func @_mlp_kernel(%arg0: i32, %arg1: memref<16x36xf32, #tpu.memory_space<vmem>>, %arg2: memref<36x128xbf16, #tpu.memory_space<vmem>>, %arg3: memref<3x128x128xbf16, #tpu.memory_space<vmem>>, %arg4: memref<4x1x128xf32, #tpu.memory_space<vmem>>, %arg5: memref<16x128xbf16, #tpu.memory_space<vmem>>) attributes {dimension_semantics = [#tpu.dimension_semantics<parallel>], iteration_bounds = array<i64: 2>, scalar_prefetch = 0 : i64, scratch_operands = 0 : i64, tpu.core_type = #tpu.core_type<tc>, window_params = [{transform_indices = @transform_0, window_bounds = array<i64: 16, 36>}, {pipeline_mode = #tpu.pipeline_mode<synchronous>, transform_indices = @transform_1, window_bounds = array<i64: 36, 128>}, {pipeline_mode = #tpu.pipeline_mode<synchronous>, transform_indices = @transform_2, window_bounds = array<i64: 3, 128, 128>}, {pipeline_mode = #tpu.pipeline_mode<synchronous>, transform_indices = @transform_3, window_bounds = array<i64: 4, 1, 128>}, {transform_indices = @transform_4, window_bounds = array<i64: 16, 128>}]} {
    %c0 = arith.constant 0 : index
    %c0_0 = arith.constant 0 : index
    %0 = vector.load %arg1[%c0, %c0_0] : memref<16x36xf32, #tpu.memory_space<vmem>>, vector<16x36xf32>
    %1 = arith.truncf %0 : vector<16x36xf32> to vector<16x36xbf16>
    %c0_1 = arith.constant 0 : index
    %c0_2 = arith.constant 0 : index
    %2 = vector.load %arg2[%c0_1, %c0_2] : memref<36x128xbf16, #tpu.memory_space<vmem>>, vector<36x128xbf16>
    %cst = arith.constant dense<0.000000e+00> : vector<16x128xf32>
    %3 = tpu.matmul %1, %2, %cst {dimension_numbers = #tpu.dot_dimension_numbers<[1], [0], [0], [1], [0, 0, 1, 1], [], []>} : vector<16x36xbf16>, vector<36x128xbf16>, vector<16x128xf32> -> vector<16x128xf32>
    %c0_3 = arith.constant 0 : index
    %c0_4 = arith.constant 0 : index
    %c0_5 = arith.constant 0 : index
    %4 = vector.load %arg4[%c0_3, %c0_4, %c0_5] : memref<4x1x128xf32, #tpu.memory_space<vmem>>, vector<1x1x128xf32>
    %5 = vector.shape_cast %4 : vector<1x1x128xf32> to vector<1x128xf32>
    %6 = vector.broadcast %5 : vector<1x128xf32> to vector<16x128xf32>
    %7 = arith.addf %3, %6 : vector<16x128xf32>
    %cst_6 = arith.constant 0.000000e+00 : f32
    %8 = vector.broadcast %cst_6 : f32 to vector<16x128xf32>
    %9 = arith.maximumf %7, %8 : vector<16x128xf32>
    %10 = arith.truncf %9 : vector<16x128xf32> to vector<16x128xbf16>
    %c0_7 = arith.constant 0 : index
    %c0_8 = arith.constant 0 : index
    %c0_9 = arith.constant 0 : index
    %11 = vector.load %arg3[%c0_7, %c0_8, %c0_9] : memref<3x128x128xbf16, #tpu.memory_space<vmem>>, vector<1x128x128xbf16>
    %12 = vector.shape_cast %11 : vector<1x128x128xbf16> to vector<128x128xbf16>
    %cst_10 = arith.constant dense<0.000000e+00> : vector<16x128xf32>
    %13 = tpu.matmul %10, %12, %cst_10 {dimension_numbers = #tpu.dot_dimension_numbers<[1], [0], [0], [1], [0, 0, 1, 1], [], []>} : vector<16x128xbf16>, vector<128x128xbf16>, vector<16x128xf32> -> vector<16x128xf32>
    %c1 = arith.constant 1 : index
    %c0_11 = arith.constant 0 : index
    %c0_12 = arith.constant 0 : index
    %14 = vector.load %arg4[%c1, %c0_11, %c0_12] : memref<4x1x128xf32, #tpu.memory_space<vmem>>, vector<1x1x128xf32>
    %15 = vector.shape_cast %14 : vector<1x1x128xf32> to vector<1x128xf32>
    %16 = vector.broadcast %15 : vector<1x128xf32> to vector<16x128xf32>
    %17 = arith.addf %13, %16 : vector<16x128xf32>
    %cst_13 = arith.constant 0.000000e+00 : f32
    %18 = vector.broadcast %cst_13 : f32 to vector<16x128xf32>
    %19 = arith.maximumf %17, %18 : vector<16x128xf32>
    %20 = arith.truncf %19 : vector<16x128xf32> to vector<16x128xbf16>
    %c1_14 = arith.constant 1 : index
    %c0_15 = arith.constant 0 : index
    %c0_16 = arith.constant 0 : index
    %21 = vector.load %arg3[%c1_14, %c0_15, %c0_16] : memref<3x128x128xbf16, #tpu.memory_space<vmem>>, vector<1x128x128xbf16>
    %22 = vector.shape_cast %21 : vector<1x128x128xbf16> to vector<128x128xbf16>
    %cst_17 = arith.constant dense<0.000000e+00> : vector<16x128xf32>
    %23 = tpu.matmul %20, %22, %cst_17 {dimension_numbers = #tpu.dot_dimension_numbers<[1], [0], [0], [1], [0, 0, 1, 1], [], []>} : vector<16x128xbf16>, vector<128x128xbf16>, vector<16x128xf32> -> vector<16x128xf32>
    %c2 = arith.constant 2 : index
    %c0_18 = arith.constant 0 : index
    %c0_19 = arith.constant 0 : index
    %24 = vector.load %arg4[%c2, %c0_18, %c0_19] : memref<4x1x128xf32, #tpu.memory_space<vmem>>, vector<1x1x128xf32>
    %25 = vector.shape_cast %24 : vector<1x1x128xf32> to vector<1x128xf32>
    %26 = vector.broadcast %25 : vector<1x128xf32> to vector<16x128xf32>
    %27 = arith.addf %23, %26 : vector<16x128xf32>
    %cst_20 = arith.constant 0.000000e+00 : f32
    %28 = vector.broadcast %cst_20 : f32 to vector<16x128xf32>
    %29 = arith.maximumf %27, %28 : vector<16x128xf32>
    %30 = arith.truncf %29 : vector<16x128xf32> to vector<16x128xbf16>
    %c2_21 = arith.constant 2 : index
    %c0_22 = arith.constant 0 : index
    %c0_23 = arith.constant 0 : index
    %31 = vector.load %arg3[%c2_21, %c0_22, %c0_23] : memref<3x128x128xbf16, #tpu.memory_space<vmem>>, vector<1x128x128xbf16>
    %32 = vector.shape_cast %31 : vector<1x128x128xbf16> to vector<128x128xbf16>
    %cst_24 = arith.constant dense<0.000000e+00> : vector<16x128xf32>
    %33 = tpu.matmul %30, %32, %cst_24 {dimension_numbers = #tpu.dot_dimension_numbers<[1], [0], [0], [1], [0, 0, 1, 1], [], []>} : vector<16x128xbf16>, vector<128x128xbf16>, vector<16x128xf32> -> vector<16x128xf32>
    %c3 = arith.constant 3 : index
    %c0_25 = arith.constant 0 : index
    %c0_26 = arith.constant 0 : index
    %34 = vector.load %arg4[%c3, %c0_25, %c0_26] : memref<4x1x128xf32, #tpu.memory_space<vmem>>, vector<1x1x128xf32>
    %35 = vector.shape_cast %34 : vector<1x1x128xf32> to vector<1x128xf32>
    %36 = vector.broadcast %35 : vector<1x128xf32> to vector<16x128xf32>
    %37 = arith.addf %33, %36 : vector<16x128xf32>
    %cst_27 = arith.constant 0.000000e+00 : f32
    %38 = vector.broadcast %cst_27 : f32 to vector<16x128xf32>
    %39 = arith.maximumf %37, %38 : vector<16x128xf32>
    %40 = arith.truncf %39 : vector<16x128xf32> to vector<16x128xbf16>
    %c0_28 = arith.constant 0 : index
    %c0_29 = arith.constant 0 : index
    %41 = vector.load %arg5[%c0_28, %c0_29] : memref<16x128xbf16, #tpu.memory_space<vmem>>, vector<16x128xbf16>
    tpu.vector_store %arg5[%c0_28, %c0_29], %40 {strides = array<i32>} : memref<16x128xbf16, #tpu.memory_space<vmem>>, vector<16x128xbf16>,
    return
  }
  func.func @transform_0(%arg0: i32) -> (i32, i32) {
    %c0_i32 = arith.constant 0 : i32
    %c0_i32_0 = arith.constant 0 : i32
    return %arg0, %c0_i32 : i32, i32
  }
  func.func @transform_1(%arg0: i32) -> (i32, i32) {
    %c0_i32 = arith.constant 0 : i32
    %c0_i32_0 = arith.constant 0 : i32
    %c0_i32_1 = arith.constant 0 : i32
    return %c0_i32, %c0_i32_0 : i32, i32
  }
  func.func @transform_2(%arg0: i32) -> (i32, i32, i32) {
    %c0_i32 = arith.constant 0 : i32
    %c0_i32_0 = arith.constant 0 : i32
    %c0_i32_1 = arith.constant 0 : i32
    %c0_i32_2 = arith.constant 0 : i32
    return %c0_i32, %c0_i32_0, %c0_i32_1 : i32, i32, i32
  }
  func.func @transform_3(%arg0: i32) -> (i32, i32, i32) {
    %c0_i32 = arith.constant 0 : i32
    %c0_i32_0 = arith.constant 0 : i32
    %c0_i32_1 = arith.constant 0 : i32
    %c0_i32_2 = arith.constant 0 : i32
    return %c0_i32, %c0_i32_0, %c0_i32_1 : i32, i32, i32
  }
  func.func @transform_4(%arg0: i32) -> (i32, i32) {
    %c0_i32 = arith.constant 0 : i32
    %c0_i32_0 = arith.constant 0 : i32
    return %arg0, %c0_i32 : i32, i32
  }
}

</mosaic_0001>

<bundles_post_ra>
// kernel: _lambda_.1
= control target key start
LH: loop header
LB: loop body
LE: loop exit
PB: predicated region body
PF: predicated region fallthrough
CT: control target
= control target key end

     0   :  { %9 = vsyncpa [#allocation3], 0  ;;  %s1002_s15 = smov 0   ;;  %s1100_s0 = inlined_call_operand.vmem [shape: f32[32,36], index: 0, kind: input, shape index: {}]   ;;  %s1101_s1 = inlined_call_operand.vmem [shape: bf16[36,128], index: 1, kind: input, shape index: {}]   ;;  %s1102_s2 = inlined_call_operand.hbm [shape: bf16[3,128,128], index: 2, kind: input, shape index: {}]   ;;  %s1103_s3 = inlined_call_operand.vmem [shape: f32[4,1,128], index: 3, kind: input, shape index: {}]   ;;  %s1104_s4 = inlined_call_operand.vmem [shape: bf16[32,128], index: 4, kind: output, shape index: {}]  }
   0x1 LB: > { %s726_s16 = sadd.s32 4294967295, %s970_s15   ;;  %p728_p0 = scmp.ge.s32.totalorder %s970_s15, 1  ;;  %s970_s15 = sphi %s1002_s15, %s15_s15  }
   0x2   : > { %p135_p1 = scmp.lt.s32.totalorder %s970_s15, 3  ;;  %s972_s17 = smov [#allocation2]  }
   0x3   : > { %s150_s18 = sshll.u32 %s972_s17, 4  ;;  %p1014_p3 = scmp.eq.s32.totalorder %s726_s16, 0  ;;  %s151_s18 = int_to_ptr.vmem [resolvable:$true] %s150_s18 }
   0x4   : > { %p1010_p2 = pnand %p728_p0, %p135_p1  ;;  %s945_s21 = scalar_lea.vmem %s151_s18, 3072 }
   0x5   : > { %p946_p7 = scmp.ne.s32.totalorder %s151_s18, %s945_s21  ;;  %p953_p10 = scmp.lt.s32.totalorder %s151_s18, %s151_s18 }
   0x6   : > { %p888_p4 = pneg %p1010_p2  ;;  %p954_p11 = scmp.lt.s32.totalorder %s945_s21, %s945_s21 }
   0x8   : > { %p889_p5 = pnand %p1014_p3, %p888_p4  ;;  %p955_p12 = por %p954_p11, %p953_p10 }
   0xa   : > { %p936_p6 = pneg %p889_p5 }
   0xc   : > { %p948_p8 = pnand %p946_p7, %p936_p6 }
   0xe   : > { %p949_p9 = pneg %p948_p8 }
  0x10   : > { %p956_p13 = pnand %p955_p12, %p949_p9 }
  0x12   : > { %959 = shalt.err (!%p956_p13)
}
  0x13   : > { %s973_s22 = smov 64   ;;  %s974_s23 = smov 4  }
  0x14   : > { %891 = dma.hbm_to_vmem [thread:$0]  (!%p889_p5), %s1102_s2, 3072, %s151_s18, [#allocation3], %s973_s22, %s973_s22, %s974_s23  }
  0x15   : > { %178 = sbr.rel (%p1010_p2) target bundleno = 854 (0x356), region = 36 }
  0x1a   : > { %965 = dma.done.wait (%p1014_p3), [#allocation3], 3072  }
  0x1b   : > { %967 = vsyncadd (%p1014_p3), [#allocation3], 4294964224  ;;  %s733_s26 = sshll.u32 %s726_s16, 1  ;;  %v975_v0 = vmov 0.0   ;;  %vm976_vm0 = vmmov 0   ;;  %vm251_vm1 = vcmask 1041408  }
  0x1c   : > { %814 = vmatprep.subr.bf16.mxu0 %v975_v0  ;;  %820 = vmatprep.mubr.msk.bf16.mxu0 %vm976_vm0, %v975_v0  ;;  %p205_p0 = scmp.lt.s32.totalorder %s733_s26, 3  ;;  %v907_v1 = vld [vmem:[%s1101_s1 + $0x10] ss:$0 sps:$4 sm:$0x33]   ;;  %v908_v3 = vld [vmem:[%s1101_s1 + $0x8] sm:$0xff]   ;;  %v910_v4 = vld [vmem:[#allocation2 + $0x38] sm:$0xff]  }
  0x1d   : > { %824 = vmatprep.subr.bf16.mxu1 %v975_v0  ;;  %840 = vmatprep.mubr.msk.bf16.mxu1 %vm976_vm0, %v975_v0  ;;  %v253_v2 = vsel %vm251_vm1, %v907_v1, 0  ;;  %v909_v5 = vld [vmem:[%s1101_s1] sm:$0xff]   ;;  %v911_v7 = vld [vmem:[#allocation2 + $0x30] sm:$0xff]   ;;  %vm247_vm2 = vcmask 293888   ;;  %v912_v9 = vld [vmem:[#allocation2 + $0x28] sm:$0xff]  }
  0x1e   : > { %s1108_s26 = smov (!%p205_p0, %s733_s26), 3  ;;  %815 = vmatpush3.bf16.msra.mxu0 %v253_v2  ;;  %825 = vmatpush3.bf16.msra.mxu1 %v910_v4  ;;  %v913_v11 = vld [vmem:[#allocation2 + $0x20] sm:$0xff]   ;;  %v914_v12 = vld [vmem:[#allocation2 + $0x18] sm:$0xff]   ;;  %v915_v13 = vld [vmem:[#allocation2 + $0x10] sm:$0xff]  }
  0x1f   : > { %s734_s27 = sshll.u32 %s1108_s26, 3  ;;  %816 = vmatprep.subr.bf16.mxu0 %v975_v0  ;;  %826 = vmatprep.subr.bf16.mxu1 %v975_v0  ;;  %v916_v14 = vld [vmem:[#allocation2 + $0x8] sm:$0xff]   ;;  %v917_v15 = vld [vmem:[#allocation2] sm:$0xff]   ;;  %v918_v16 = vld [vmem:[#allocation2 + $0x78] sm:$0xff]   ;;  %s736_s20 = sshll.u32 %s1108_s26, 2 }
  0x20   : > { %s208_s6 = scalar_lea.vmem %s1100_s0, %s734_s27  ;;  %v919_v17 = vld [vmem:[#allocation2 + $0x70] sm:$0xff]   ;;  %v920_v18 = vld [vmem:[#allocation2 + $0x68] sm:$0xff]   ;;  %v921_v19 = vld [vmem:[#allocation2 + $0x60] sm:$0xff]   ;;  %s214_s23 = scalar_lea.vmem %s1104_s4, %s736_s20 }
  0x21   : > { %v217_v6 = vld [vmem:[%s208_s6] sm:$0xff]  ;;  %v218_v8 = vld [vmem:[%s208_s6 + $0x8] sm:$0xff]  ;;  %v922_v20 = vld [vmem:[#allocation2 + $0x58] sm:$0xff]  }
  0x22   : > { %817 = vmatpush3.bf16.msra.mxu0 %v908_v3  ;;  %v219_v10 = vpack.c.bf16 %v218_v8, %v217_v6  ;;  %827 = vmatpush3.bf16.msra.mxu1 %v911_v7  ;;  %v737_v21 = vld [vmem:[%s1103_s3] ss:$0 sm:$0xff]  ;;  %v923_v31 = vld [vmem:[#allocation2 + $0x50] sm:$0xff]   ;;  %v924_v32 = vld [vmem:[#allocation2 + $0x48] sm:$0xff]  }
  0x23   : > { %818 = vmatprep.subr.bf16.mxu0 %v975_v0  ;;  %828 = vmatprep.subr.bf16.mxu1 %v975_v0  ;;  %v925_v33 = vld [vmem:[#allocation2 + $0x40] sm:$0xff]   ;;  %v926_v34 = vld [vmem:[#allocation2 + $0xb8] sm:$0xff]   ;;  %v927_v35 = vld [vmem:[#allocation2 + $0xb0] sm:$0xff]  }
  0x24   : > { %v928_v36 = vld [vmem:[#allocation2 + $0xa8] sm:$0xff]   ;;  %v929_v37 = vld [vmem:[#allocation2 + $0xa0] sm:$0xff]   ;;  %v930_v38 = vld [vmem:[#allocation2 + $0x98] sm:$0xff]  }
  0x25   : > { %v743_v39 = vld [vmem:[%s1103_s3 + $0x1] ss:$0 sm:$0xff]  ;;  %v931_v49 = vld [vmem:[#allocation2 + $0x90] sm:$0xff]   ;;  %v932_v50 = vld [vmem:[#allocation2 + $0x88] sm:$0xff]  }
  0x26   : > { %819 = vmatpush3.bf16.msra.mxu0 %v909_v5  ;;  %829 = vmatpush3.bf16.msra.mxu1 %v912_v9  ;;  %v933_v51 = vld [vmem:[#allocation2 + $0x80] sm:$0xff]  }
  0x27   : > { %844 = vmatprep.subr.bf16.mxu0 %v975_v0  ;;  %830 = vmatprep.subr.bf16.mxu1 %v975_v0  ;;  %v753_v52 = vld [vmem:[%s1103_s3 + $0x2] ss:$0 sm:$0xff]  ;;  %v763_v62 = vld [vmem:[%s1103_s3 + $0x3] ss:$0 sm:$0xff] }
  0x29   : > { %821 = vmatmul.mubr.msk.bf16.vlgmr.msra.gmra.mxu0 %vm247_vm2, %v219_v10 }
  0x2a   : > { %860 = vmatprep.mubr.msk.bf16.mxu0 %vm976_vm0, %v975_v0  ;;  %831 = vmatpush3.bf16.msra.mxu1 %v913_v11 }
  0x2b   : > { %832 = vmatprep.subr.bf16.mxu1 %v975_v0  ;;  %845 = vmatpush3.bf16.msra.mxu0 %v918_v16 }
  0x2c   : > { %846 = vmatprep.subr.bf16.mxu0 %v975_v0 }
  0x2e   : > { %833 = vmatpush3.bf16.msra.mxu1 %v914_v12 }
  0x2f   : > { %834 = vmatprep.subr.bf16.mxu1 %v975_v0  ;;  %847 = vmatpush3.bf16.msra.mxu0 %v919_v17 }
  0x30   : > { %848 = vmatprep.subr.bf16.mxu0 %v975_v0 }
  0x32   : > { %835 = vmatpush3.bf16.msra.mxu1 %v915_v13 }
  0x33   : > { %836 = vmatprep.subr.bf16.mxu1 %v975_v0  ;;  %849 = vmatpush3.bf16.msra.mxu0 %v920_v18 }
  0x34   : > { %850 = vmatprep.subr.bf16.mxu0 %v975_v0 }
  0x36   : > { %837 = vmatpush3.bf16.msra.mxu1 %v916_v14 }
  0x37   : > { %838 = vmatprep.subr.bf16.mxu1 %v975_v0  ;;  %851 = vmatpush3.bf16.msra.mxu0 %v921_v19 }
  0x38   : > { %852 = vmatprep.subr.bf16.mxu0 %v975_v0 }
  0x3a   : > { %839 = vmatpush3.bf16.msra.mxu1 %v917_v15 }
  0x3b   : > { %864 = vmatprep.subr.bf16.mxu1 %v975_v0  ;;  %853 = vmatpush3.bf16.msra.mxu0 %v922_v20 }
  0x3c   : > { %854 = vmatprep.subr.bf16.mxu0 %v975_v0 }
  0x3f   : > { %855 = vmatpush3.bf16.msra.mxu0 %v923_v31 }
  0x40   : > { %856 = vmatprep.subr.bf16.mxu0 %v975_v0 }
  0x43   : > { %857 = vmatpush3.bf16.msra.mxu0 %v924_v32 }
  0x44   : > { %858 = vmatprep.subr.bf16.mxu0 %v975_v0 }
  0x47   : > { %859 = vmatpush3.bf16.msra.mxu0 %v925_v33 }
  0xe9   : > { %v289_v22 = vpop.f32.mrf.mxu0 }
  0xea   : > { %v290_v24 = vadd.f32 %v737_v21, %v289_v22 }
  0xeb   : > { %v822_v23 = vpop.f32.mrf.mxu0 }
  0xec   : > { %v296_v28 = vmax.f32 %v290_v24, 0.0 }
  0xed   : > { %v292_v25 = vpop.f32.mrf.mxu0 }
  0xee   : > { %v293_v26 = vadd.f32 %v737_v21, %v292_v25 }
  0xef   : > { %v823_v27 = vpop.f32.mrf.mxu0 }
  0xf0   : > { %v297_v29 = vmax.f32 %v293_v26, 0.0 }
  0xf2   : > { %v298_v30 = vpack.c.bf16 %v297_v29, %v296_v28 }
  0xf4   : > { %841 = vmatmul.mubr.bf16.vlgmr.msra.gmra.mxu1 %v298_v30 }
  0xf5   : > { %880 = vmatprep.mubr.msk.bf16.mxu1 %vm976_vm0, %v975_v0  ;;  %865 = vmatpush3.bf16.msra.mxu1 %v926_v34 }
  0xf6   : > { %866 = vmatprep.subr.bf16.mxu1 %v975_v0 }
  0xf9   : > { %867 = vmatpush3.bf16.msra.mxu1 %v927_v35 }
  0xfa   : > { %868 = vmatprep.subr.bf16.mxu1 %v975_v0 }
  0xfd   : > { %869 = vmatpush3.bf16.msra.mxu1 %v928_v36 }
  0xfe   : > { %870 = vmatprep.subr.bf16.mxu1 %v975_v0 }
 0x101   : > { %871 = vmatpush3.bf16.msra.mxu1 %v929_v37 }
 0x102   : > { %872 = vmatprep.subr.bf16.mxu1 %v975_v0 }
 0x105   : > { %873 = vmatpush3.bf16.msra.mxu1 %v930_v38 }
 0x106   : > { %874 = vmatprep.subr.bf16.mxu1 %v975_v0 }
 0x109   : > { %875 = vmatpush3.bf16.msra.mxu1 %v931_v49 }
 0x10a   : > { %876 = vmatprep.subr.bf16.mxu1 %v975_v0 }
 0x10d   : > { %877 = vmatpush3.bf16.msra.mxu1 %v932_v50 }
 0x10e   : > { %878 = vmatprep.subr.bf16.mxu1 %v975_v0 }
 0x111   : > { %879 = vmatpush3.bf16.msra.mxu1 %v933_v51 }
 0x1b4   : > { %v405_v40 = vpop.f32.mrf.mxu1 }
 0x1b5   : > { %v406_v42 = vadd.f32 %v743_v39, %v405_v40 }
 0x1b6   : > { %v842_v41 = vpop.f32.mrf.mxu1 }
 0x1b7   : > { %v412_v46 = vmax.f32 %v406_v42, 0.0 }
 0x1b8   : > { %v408_v43 = vpop.f32.mrf.mxu1 }
 0x1b9   : > { %v409_v44 = vadd.f32 %v743_v39, %v408_v43 }
 0x1ba   : > { %v843_v45 = vpop.f32.mrf.mxu1 }
 0x1bb   : > { %v413_v47 = vmax.f32 %v409_v44, 0.0 }
 0x1bd   : > { %v414_v48 = vpack.c.bf16 %v413_v47, %v412_v46 }
 0x1bf   : > { %861 = vmatmul.mubr.bf16.vlgmr.msra.gmra.mxu0 %v414_v48 }
 0x27f   : > { %v522_v53 = vpop.f32.mrf.mxu0 }
 0x280   : > { %v523_v55 = vadd.f32 %v753_v52, %v522_v53 }
 0x281   : > { %v862_v54 = vpop.f32.mrf.mxu0 }
 0x282   : > { %v529_v59 = vmax.f32 %v523_v55, 0.0 }
 0x283   : > { %v525_v56 = vpop.f32.mrf.mxu0 }
 0x284   : > { %v526_v57 = vadd.f32 %v753_v52, %v525_v56 }
 0x285   : > { %v863_v58 = vpop.f32.mrf.mxu0 }
 0x286   : > { %v530_v60 = vmax.f32 %v526_v57, 0.0 }
 0x288   : > { %v531_v61 = vpack.c.bf16 %v530_v60, %v529_v59 }
 0x28a   : > { %881 = vmatmul.mubr.bf16.vlgmr.msra.gmra.mxu1 %v531_v61 }
 0x34a   : > { %v639_v63 = vpop.f32.mrf.mxu1 }
 0x34b   : > { %v640_v1 = vadd.f32 %v763_v62, %v639_v63 }
 0x34c   : > { %v882_v0 = vpop.f32.mrf.mxu1 }
 0x34d   : > { %v646_v5 = vmax.f32 %v640_v1, 0.0 }
 0x34e   : > { %v642_v2 = vpop.f32.mrf.mxu1 }
 0x34f   : > { %v643_v3 = vadd.f32 %v763_v62, %v642_v2 }
 0x350   : > { %v883_v4 = vpop.f32.mrf.mxu1 }
 0x351   : > { %v647_v6 = vmax.f32 %v643_v3, 0.0 }
 0x353   : > { %v781_v7 = vpack.c.bf16 %v647_v6, %v646_v5 }
 0x355   : > { %782 = vst [vmem:[%s214_s23] sm:$0xff] %v781_v7  }
 0x356 PF: > { %s15_s15 = sadd.s32 1, %s970_s15  }
 0x357   : > { %p12_p1 = scmp.ge.s32.totalorder %s15_s15, 4  }
 0x359   :  { %14 = sbr.rel (!%p12_p1) target bundleno = 1 (0x1), region = 76 }
 0x35e   :  { %680 = vsyncpa [#allocation3], 1 }
 0x35f   :  { %682 = vsyncpa [#allocation3 + $0x1], 1 }

</bundles_post_ra>
